<compile_context>
chip_gen: v5e
topology: v5e:2x2
jax: 0.10.0
libtpu: 0.0.40
codegen_flags: <defaults>
</compile_context>

<pallas_src>
import jax
import jax.numpy as jnp
from jax.experimental import pallas as pl
from jax.experimental.pallas import tpu as pltpu


def _round_up(x, m):
    return (x + m - 1) // m * m


def autoencoder_kernel(x_ref,
                       w1_ref, b1_ref, w2_ref, b2_ref, w3_ref, b3_ref,
                       w4_ref, b4_ref, w5_ref, b5_ref, w6_ref, b6_ref,
                       rec_ref, enc_ref):
    """One batch tile of the fused 6-layer autoencoder MLP.

    Weights are pre-transposed [in, out]; w1/w6 are bf16 (wide D matmuls), the
    tiny middle-layer weights stay f32.  Biases are (1, out) f32.  Matmuls
    accumulate in f32 on the MXU; bias + tanh run in f32 on VPU/EUP.
    """
    cdt = w1_ref.dtype  # MXU operand dtype for the two wide matmuls (bf16)

    def layer(h, w_ref, b_ref, act):
        y = jnp.dot(h, w_ref[...], preferred_element_type=jnp.float32)
        y = y + b_ref[...]
        return jnp.tanh(y) if act else y

    # x arrives f32 straight from HBM; cast once in-kernel (no host-side copy).
    x = x_ref[...].astype(cdt)                            # [TB, D] bf16
    h = layer(x, w1_ref, b1_ref, True)                    # [TB, 32] f32
    h = layer(h, w2_ref, b2_ref, True)                    # [TB, 16] f32
    enc = layer(h, w3_ref, b3_ref, True)                  # [TB, E]  f32
    d = layer(enc, w4_ref, b4_ref, True)                  # [TB, 16] f32
    d = layer(d, w5_ref, b5_ref, True)                    # [TB, 32] f32
    rec = layer(d.astype(cdt), w6_ref, b6_ref, False)     # [TB, D]  f32

    enc_ref[...] = enc.astype(enc_ref.dtype)
    rec_ref[...] = rec.astype(rec_ref.dtype)


def prep_params(raw_params, compute_dtype=jnp.bfloat16):
    """One-time parameter preprocessing (do this at init, not per forward).

    raw_params: list of (w [out, in] f32, b [out] f32) in layer order
                (enc L1..L3, dec L1..L3), same layout as nn.Linear.
    Returns a flat tuple (w1_t, b1, ..., w6_t, b6):
      w1_t / w6_t : [in, out] in `compute_dtype` (the two wide matmuls),
      w2..w5      : [in, out] float32 (tiny, VMEM-resident — bf16 saves nothing),
      b*          : (1, out) float32.
    """
    prepped = []
    n = len(raw_params)
    for i, (w, b) in enumerate(raw_params):
        dt = compute_dtype if i in (0, n - 1) else jnp.float32
        prepped.append(jnp.asarray(w.T, dt))                        # [in, out]
        prepped.append(jnp.asarray(b, jnp.float32).reshape(1, -1))  # (1, out)
    return tuple(prepped)


def _choose_tb(B, block_batch):
    """Pick a batch-tile size TB and the (possibly padded) batch extent.

    Goals: TB multiple of 16 (safe for bf16 outputs), >= 2 grid steps when the
    batch allows (v7x megacore), and — when B is a multiple of 16 — a divisor
    of B so no pad / output-slice HBM copies are needed.
    """
    B_al = _round_up(B, 16)
    tb_cap = max(16, min(block_batch, _round_up(pl.cdiv(B_al, 2), 16)))
    if B % 16 == 0:
        tb = tb_cap
        while tb >= 16 and B % tb != 0:
            tb -= 16
        if tb >= max(16, tb_cap // 2):
            return tb, B                      # TB | B: no pad, no slice
    return tb_cap, _round_up(B, tb_cap)


def autoencoder_forward(x, prepped, *, block_batch=2048, rec_dtype=jnp.float32):
    """x: [B, C, W, W] f32 -> (reconstruction [B, C, W, W] rec_dtype, enc [B, E] f32).

    block_batch: rows per grid step.  2048 keeps the double-buffered VMEM
    footprint (~8 MiB) inside every generation's scoped-VMEM default; on
    v6e/v7x it can be raised to 4096 (set vmem_limit_bytes if needed).
    """
    orig_shape = x.shape
    B = orig_shape[0]
    w1_t = prepped[0]
    D = w1_t.shape[0]              # C * W * W (flattened feature dim)
    E = prepped[5].shape[1]        # enc_dim (from b3)

    # Flatten only (matches torch .flatten(start_dim=1)). No dtype convert here:
    # a materialized bf16 copy would ADD an HBM round trip (4B rd + 2B wr + 2B rd).
    x2 = x.reshape(B, D)

    TB, B_pad = _choose_tb(B, block_batch)
    if B_pad != B:
        x2 = jnp.pad(x2, ((0, B_pad - B), (0, 0)))

    grid = (B_pad // TB,)

    def x_map(i):
        return (i, 0)

    def w_map(i):
        return (0, 0)   # weights/biases stay VMEM-resident across grid steps

    in_specs = [pl.BlockSpec((TB, D), x_map)]
    in_specs += [pl.BlockSpec(t.shape, w_map) for t in prepped]

    out_shape = (jax.ShapeDtypeStruct((B_pad, D), rec_dtype),
                 jax.ShapeDtypeStruct((B_pad, E), jnp.float32))
    out_specs = [pl.BlockSpec((TB, D), x_map),
                 pl.BlockSpec((TB, E), x_map)]

    rec, enc = pl.pallas_call(
        autoencoder_kernel,
        out_shape=out_shape,
        grid_spec=pltpu.PrefetchScalarGridSpec(
            num_scalar_prefetch=0,
            grid=grid,
            in_specs=in_specs,
            out_specs=out_specs,
        ),
        compiler_params=pltpu.CompilerParams(
            dimension_semantics=("parallel",)),   # shard batch tiles across TCs
    )(x2, *prepped)

    if B_pad != B:
        rec = rec[:B]
        enc = enc[:B]
    return rec.reshape(orig_shape), enc


def init_params(key, width=16, colorchs=1, enc_dim=8):
    """Deterministic init matching nn.Linear shapes ([out, in], [out])."""
    D = colorchs * width * width
    dims = [(D, 32), (32, 16), (16, enc_dim), (enc_dim, 16), (16, 32), (32, D)]
    params = []
    for fan_in, fan_out in dims:
        key, kw, kb = jax.random.split(key, 3)
        bound = float(fan_in) ** -0.5
        w = jax.random.uniform(kw, (fan_out, fan_in), jnp.float32, -bound, bound)
        b = jax.random.uniform(kb, (fan_out,), jnp.float32, -bound, bound)
        params.append((w, b))
    return params


def reference_forward(x, raw_params):
    """Plain-JAX f32 reference of AutoEncoder.forward."""
    B = x.shape[0]
    h = x.reshape(B, -1)
    enc = None
    n = len(raw_params)
    for i, (w, b) in enumerate(raw_params):
        h = h @ w.T + b
        if i != n - 1:
            h = jnp.tanh(h)
        if i == 2:
            enc = h
    return h.reshape(x.shape), enc


if __name__ == "__main__":
    key = jax.random.PRNGKey(0)
    kx, kx2, kp = jax.random.split(key, 3)

    WIDTH, CH, ENC_DIM = 16, 1, 8
    BATCH = 2

    raw_params = init_params(kp, WIDTH, CH, ENC_DIM)
    prepped = prep_params(raw_params)   # one-time: transpose + (w1/w6) bf16 cast

    # --- small batch (padded to one 16-row tile), f32 reconstruction ---
    x = jax.random.normal(kx, (BATCH, CH, WIDTH, WIDTH), jnp.float32)
    rec, enc = autoencoder_forward(x, prepped)
    jax.block_until_ready((rec, enc))

    rec_ref, enc_ref = reference_forward(x, raw_params)
    assert rec.shape == x.shape and rec.dtype == jnp.float32
    assert enc.shape == (BATCH, ENC_DIM)
    assert jnp.allclose(rec, rec_ref, atol=3e-2, rtol=3e-2)
    assert jnp.allclose(enc, enc_ref, atol=3e-2, rtol=3e-2)

    # --- multi-step grid (TB divides B -> no pad / no slice), bf16 rec output ---
    B2 = 48
    x2 = jax.random.normal(kx2, (B2, CH, WIDTH, WIDTH), jnp.float32)
    rec2, enc2 = autoencoder_forward(x2, prepped, block_batch=32,
                                     rec_dtype=jnp.bfloat16)
    jax.block_until_ready((rec2, enc2))

    rec2_ref, enc2_ref = reference_forward(x2, raw_params)
    assert rec2.shape == x2.shape and rec2.dtype == jnp.bfloat16
    assert enc2.shape == (B2, ENC_DIM)
    assert jnp.allclose(rec2.astype(jnp.float32), rec2_ref, atol=5e-2, rtol=5e-2)
    assert jnp.allclose(enc2, enc2_ref, atol=3e-2, rtol=3e-2)

    print("KERNEL_OK")
</pallas_src>

<mosaic_0001>
module attributes {stable_mosaic.version = 11 : i64} {
  func.func @autoencoder_kernel(%arg0: i32, %arg1: memref<16x256xf32, #tpu.memory_space<vmem>>, %arg2: memref<256x32xbf16, #tpu.memory_space<vmem>>, %arg3: memref<1x32xf32, #tpu.memory_space<vmem>>, %arg4: memref<32x16xf32, #tpu.memory_space<vmem>>, %arg5: memref<1x16xf32, #tpu.memory_space<vmem>>, %arg6: memref<16x8xf32, #tpu.memory_space<vmem>>, %arg7: memref<1x8xf32, #tpu.memory_space<vmem>>, %arg8: memref<8x16xf32, #tpu.memory_space<vmem>>, %arg9: memref<1x16xf32, #tpu.memory_space<vmem>>, %arg10: memref<16x32xf32, #tpu.memory_space<vmem>>, %arg11: memref<1x32xf32, #tpu.memory_space<vmem>>, %arg12: memref<32x256xbf16, #tpu.memory_space<vmem>>, %arg13: memref<1x256xf32, #tpu.memory_space<vmem>>, %arg14: memref<16x256xf32, #tpu.memory_space<vmem>>, %arg15: memref<16x8xf32, #tpu.memory_space<vmem>>) attributes {dimension_semantics = [#tpu.dimension_semantics<parallel>], iteration_bounds = array<i64: 1>, scalar_prefetch = 0 : i64, scratch_operands = 0 : i64, tpu.core_type = #tpu.core_type<tc>, window_params = [{transform_indices = @transform_0, window_bounds = array<i64: 16, 256>}, {pipeline_mode = #tpu.pipeline_mode<synchronous>, transform_indices = @transform_1, window_bounds = array<i64: 256, 32>}, {pipeline_mode = #tpu.pipeline_mode<synchronous>, transform_indices = @transform_2, window_bounds = array<i64: 1, 32>}, {pipeline_mode = #tpu.pipeline_mode<synchronous>, transform_indices = @transform_3, window_bounds = array<i64: 32, 16>}, {pipeline_mode = #tpu.pipeline_mode<synchronous>, transform_indices = @transform_4, window_bounds = array<i64: 1, 16>}, {pipeline_mode = #tpu.pipeline_mode<synchronous>, transform_indices = @transform_5, window_bounds = array<i64: 16, 8>}, {pipeline_mode = #tpu.pipeline_mode<synchronous>, transform_indices = @transform_6, window_bounds = array<i64: 1, 8>}, {pipeline_mode = #tpu.pipeline_mode<synchronous>, transform_indices = @transform_7, window_bounds = array<i64: 8, 16>}, {pipeline_mode = #tpu.pipeline_mode<synchronous>, transform_indices = @transform_8, window_bounds = array<i64: 1, 16>}, {pipeline_mode = #tpu.pipeline_mode<synchronous>, transform_indices = @transform_9, window_bounds = array<i64: 16, 32>}, {pipeline_mode = #tpu.pipeline_mode<synchronous>, transform_indices = @transform_10, window_bounds = array<i64: 1, 32>}, {pipeline_mode = #tpu.pipeline_mode<synchronous>, transform_indices = @transform_11, window_bounds = array<i64: 32, 256>}, {pipeline_mode = #tpu.pipeline_mode<synchronous>, transform_indices = @transform_12, window_bounds = array<i64: 1, 256>}, {transform_indices = @transform_13, window_bounds = array<i64: 16, 256>}, {transform_indices = @transform_14, window_bounds = array<i64: 16, 8>}]} {
    %c0 = arith.constant 0 : index
    %c0_0 = arith.constant 0 : index
    %0 = vector.load %arg1[%c0, %c0_0] : memref<16x256xf32, #tpu.memory_space<vmem>>, vector<16x256xf32>
    %1 = arith.truncf %0 : vector<16x256xf32> to vector<16x256xbf16>
    %c0_1 = arith.constant 0 : index
    %c0_2 = arith.constant 0 : index
    %2 = vector.load %arg2[%c0_1, %c0_2] : memref<256x32xbf16, #tpu.memory_space<vmem>>, vector<256x32xbf16>
    %cst = arith.constant dense<0.000000e+00> : vector<16x32xf32>
    %3 = tpu.matmul %1, %2, %cst {dimension_numbers = #tpu.dot_dimension_numbers<[1], [0], [0], [1], [0, 0, 1, 1], [], []>} : vector<16x256xbf16>, vector<256x32xbf16>, vector<16x32xf32> -> vector<16x32xf32>
    %c0_3 = arith.constant 0 : index
    %c0_4 = arith.constant 0 : index
    %4 = vector.load %arg3[%c0_3, %c0_4] : memref<1x32xf32, #tpu.memory_space<vmem>>, vector<1x32xf32>
    %5 = vector.broadcast %4 : vector<1x32xf32> to vector<16x32xf32>
    %6 = arith.addf %3, %5 : vector<16x32xf32>
    %7 = math.tanh %6 : vector<16x32xf32>
    %c0_5 = arith.constant 0 : index
    %c0_6 = arith.constant 0 : index
    %8 = vector.load %arg4[%c0_5, %c0_6] : memref<32x16xf32, #tpu.memory_space<vmem>>, vector<32x16xf32>
    %cst_7 = arith.constant dense<0.000000e+00> : vector<16x16xf32>
    %9 = tpu.matmul %7, %8, %cst_7 {dimension_numbers = #tpu.dot_dimension_numbers<[1], [0], [0], [1], [0, 0, 1, 1], [], []>} : vector<16x32xf32>, vector<32x16xf32>, vector<16x16xf32> -> vector<16x16xf32>
    %c0_8 = arith.constant 0 : index
    %c0_9 = arith.constant 0 : index
    %10 = vector.load %arg5[%c0_8, %c0_9] : memref<1x16xf32, #tpu.memory_space<vmem>>, vector<1x16xf32>
    %11 = vector.broadcast %10 : vector<1x16xf32> to vector<16x16xf32>
    %12 = arith.addf %9, %11 : vector<16x16xf32>
    %13 = math.tanh %12 : vector<16x16xf32>
    %c0_10 = arith.constant 0 : index
    %c0_11 = arith.constant 0 : index
    %14 = vector.load %arg6[%c0_10, %c0_11] : memref<16x8xf32, #tpu.memory_space<vmem>>, vector<16x8xf32>
    %cst_12 = arith.constant dense<0.000000e+00> : vector<16x8xf32>
    %15 = tpu.matmul %13, %14, %cst_12 {dimension_numbers = #tpu.dot_dimension_numbers<[1], [0], [0], [1], [0, 0, 1, 1], [], []>} : vector<16x16xf32>, vector<16x8xf32>, vector<16x8xf32> -> vector<16x8xf32>
    %c0_13 = arith.constant 0 : index
    %c0_14 = arith.constant 0 : index
    %16 = vector.load %arg7[%c0_13, %c0_14] : memref<1x8xf32, #tpu.memory_space<vmem>>, vector<1x8xf32>
    %17 = vector.broadcast %16 : vector<1x8xf32> to vector<16x8xf32>
    %18 = arith.addf %15, %17 : vector<16x8xf32>
    %19 = math.tanh %18 : vector<16x8xf32>
    %c0_15 = arith.constant 0 : index
    %c0_16 = arith.constant 0 : index
    %20 = vector.load %arg8[%c0_15, %c0_16] : memref<8x16xf32, #tpu.memory_space<vmem>>, vector<8x16xf32>
    %cst_17 = arith.constant dense<0.000000e+00> : vector<16x16xf32>
    %21 = tpu.matmul %19, %20, %cst_17 {dimension_numbers = #tpu.dot_dimension_numbers<[1], [0], [0], [1], [0, 0, 1, 1], [], []>} : vector<16x8xf32>, vector<8x16xf32>, vector<16x16xf32> -> vector<16x16xf32>
    %c0_18 = arith.constant 0 : index
    %c0_19 = arith.constant 0 : index
    %22 = vector.load %arg9[%c0_18, %c0_19] : memref<1x16xf32, #tpu.memory_space<vmem>>, vector<1x16xf32>
    %23 = vector.broadcast %22 : vector<1x16xf32> to vector<16x16xf32>
    %24 = arith.addf %21, %23 : vector<16x16xf32>
    %25 = math.tanh %24 : vector<16x16xf32>
    %c0_20 = arith.constant 0 : index
    %c0_21 = arith.constant 0 : index
    %26 = vector.load %arg10[%c0_20, %c0_21] : memref<16x32xf32, #tpu.memory_space<vmem>>, vector<16x32xf32>
    %cst_22 = arith.constant dense<0.000000e+00> : vector<16x32xf32>
    %27 = tpu.matmul %25, %26, %cst_22 {dimension_numbers = #tpu.dot_dimension_numbers<[1], [0], [0], [1], [0, 0, 1, 1], [], []>} : vector<16x16xf32>, vector<16x32xf32>, vector<16x32xf32> -> vector<16x32xf32>
    %c0_23 = arith.constant 0 : index
    %c0_24 = arith.constant 0 : index
    %28 = vector.load %arg11[%c0_23, %c0_24] : memref<1x32xf32, #tpu.memory_space<vmem>>, vector<1x32xf32>
    %29 = vector.broadcast %28 : vector<1x32xf32> to vector<16x32xf32>
    %30 = arith.addf %27, %29 : vector<16x32xf32>
    %31 = math.tanh %30 : vector<16x32xf32>
    %32 = arith.truncf %31 : vector<16x32xf32> to vector<16x32xbf16>
    %c0_25 = arith.constant 0 : index
    %c0_26 = arith.constant 0 : index
    %33 = vector.load %arg12[%c0_25, %c0_26] : memref<32x256xbf16, #tpu.memory_space<vmem>>, vector<32x256xbf16>
    %cst_27 = arith.constant dense<0.000000e+00> : vector<16x256xf32>
    %34 = tpu.matmul %32, %33, %cst_27 {dimension_numbers = #tpu.dot_dimension_numbers<[1], [0], [0], [1], [0, 0, 1, 1], [], []>} : vector<16x32xbf16>, vector<32x256xbf16>, vector<16x256xf32> -> vector<16x256xf32>
    %c0_28 = arith.constant 0 : index
    %c0_29 = arith.constant 0 : index
    %35 = vector.load %arg13[%c0_28, %c0_29] : memref<1x256xf32, #tpu.memory_space<vmem>>, vector<1x256xf32>
    %36 = vector.broadcast %35 : vector<1x256xf32> to vector<16x256xf32>
    %37 = arith.addf %34, %36 : vector<16x256xf32>
    %c0_30 = arith.constant 0 : index
    %c0_31 = arith.constant 0 : index
    %38 = vector.load %arg15[%c0_30, %c0_31] : memref<16x8xf32, #tpu.memory_space<vmem>>, vector<16x8xf32>
    tpu.vector_store %arg15[%c0_30, %c0_31], %19 {strides = array<i32>} : memref<16x8xf32, #tpu.memory_space<vmem>>, vector<16x8xf32>,
    %c0_32 = arith.constant 0 : index
    %c0_33 = arith.constant 0 : index
    %39 = vector.load %arg14[%c0_32, %c0_33] : memref<16x256xf32, #tpu.memory_space<vmem>>, vector<16x256xf32>
    tpu.vector_store %arg14[%c0_32, %c0_33], %37 {strides = array<i32>} : memref<16x256xf32, #tpu.memory_space<vmem>>, vector<16x256xf32>,
    return
  }
  func.func @transform_0(%arg0: i32) -> (i32, i32) {
    %c0_i32 = arith.constant 0 : i32
    %c0_i32_0 = arith.constant 0 : i32
    return %arg0, %c0_i32 : i32, i32
  }
  func.func @transform_1(%arg0: i32) -> (i32, i32) {
    %c0_i32 = arith.constant 0 : i32
    %c0_i32_0 = arith.constant 0 : i32
    %c0_i32_1 = arith.constant 0 : i32
    return %c0_i32, %c0_i32_0 : i32, i32
  }
  func.func @transform_2(%arg0: i32) -> (i32, i32) {
    %c0_i32 = arith.constant 0 : i32
    %c0_i32_0 = arith.constant 0 : i32
    %c0_i32_1 = arith.constant 0 : i32
    return %c0_i32, %c0_i32_0 : i32, i32
  }
  func.func @transform_3(%arg0: i32) -> (i32, i32) {
    %c0_i32 = arith.constant 0 : i32
    %c0_i32_0 = arith.constant 0 : i32
    %c0_i32_1 = arith.constant 0 : i32
    return %c0_i32, %c0_i32_0 : i32, i32
  }
  func.func @transform_4(%arg0: i32) -> (i32, i32) {
    %c0_i32 = arith.constant 0 : i32
    %c0_i32_0 = arith.constant 0 : i32
    %c0_i32_1 = arith.constant 0 : i32
    return %c0_i32, %c0_i32_0 : i32, i32
  }
  func.func @transform_5(%arg0: i32) -> (i32, i32) {
    %c0_i32 = arith.constant 0 : i32
    %c0_i32_0 = arith.constant 0 : i32
    %c0_i32_1 = arith.constant 0 : i32
    return %c0_i32, %c0_i32_0 : i32, i32
  }
  func.func @transform_6(%arg0: i32) -> (i32, i32) {
    %c0_i32 = arith.constant 0 : i32
    %c0_i32_0 = arith.constant 0 : i32
    %c0_i32_1 = arith.constant 0 : i32
    return %c0_i32, %c0_i32_0 : i32, i32
  }
  func.func @transform_7(%arg0: i32) -> (i32, i32) {
    %c0_i32 = arith.constant 0 : i32
    %c0_i32_0 = arith.constant 0 : i32
    %c0_i32_1 = arith.constant 0 : i32
    return %c0_i32, %c0_i32_0 : i32, i32
  }
  func.func @transform_8(%arg0: i32) -> (i32, i32) {
    %c0_i32 = arith.constant 0 : i32
    %c0_i32_0 = arith.constant 0 : i32
    %c0_i32_1 = arith.constant 0 : i32
    return %c0_i32, %c0_i32_0 : i32, i32
  }
  func.func @transform_9(%arg0: i32) -> (i32, i32) {
    %c0_i32 = arith.constant 0 : i32
    %c0_i32_0 = arith.constant 0 : i32
    %c0_i32_1 = arith.constant 0 : i32
    return %c0_i32, %c0_i32_0 : i32, i32
  }
  func.func @transform_10(%arg0: i32) -> (i32, i32) {
    %c0_i32 = arith.constant 0 : i32
    %c0_i32_0 = arith.constant 0 : i32
    %c0_i32_1 = arith.constant 0 : i32
    return %c0_i32, %c0_i32_0 : i32, i32
  }
  func.func @transform_11(%arg0: i32) -> (i32, i32) {
    %c0_i32 = arith.constant 0 : i32
    %c0_i32_0 = arith.constant 0 : i32
    %c0_i32_1 = arith.constant 0 : i32
    return %c0_i32, %c0_i32_0 : i32, i32
  }
  func.func @transform_12(%arg0: i32) -> (i32, i32) {
    %c0_i32 = arith.constant 0 : i32
    %c0_i32_0 = arith.constant 0 : i32
    %c0_i32_1 = arith.constant 0 : i32
    return %c0_i32, %c0_i32_0 : i32, i32
  }
  func.func @transform_13(%arg0: i32) -> (i32, i32) {
    %c0_i32 = arith.constant 0 : i32
    %c0_i32_0 = arith.constant 0 : i32
    return %arg0, %c0_i32 : i32, i32
  }
  func.func @transform_14(%arg0: i32) -> (i32, i32) {
    %c0_i32 = arith.constant 0 : i32
    %c0_i32_0 = arith.constant 0 : i32
    return %arg0, %c0_i32 : i32, i32
  }
}

</mosaic_0001>

<bundles_post_ra>
// kernel: tpu_custom_call.1
= control target key start
LH: loop header
LB: loop body
LE: loop exit
PB: predicated region body
PF: predicated region fallthrough
CT: control target
= control target key end

     0   :  { %s846_s0 = inlined_call_operand.vmem [shape: f32[16,256], index: 0, kind: input, shape index: {}]   ;;  %s847_s1 = inlined_call_operand.vmem [shape: bf16[256,32], index: 1, kind: input, shape index: {}]   ;;  %s848_s2 = inlined_call_operand.vmem [shape: f32[1,32], index: 2, kind: input, shape index: {}]   ;;  %s849_s3 = inlined_call_operand.vmem [shape: f32[32,16], index: 3, kind: input, shape index: {}]   ;;  %s850_s4 = inlined_call_operand.vmem [shape: f32[1,16], index: 4, kind: input, shape index: {}]   ;;  %s851_s5 = inlined_call_operand.vmem [shape: f32[16,8], index: 5, kind: input, shape index: {}]   ;;  %s852_s6 = inlined_call_operand.vmem [shape: f32[1,8], index: 6, kind: input, shape index: {}]   ;;  %s853_s7 = inlined_call_operand.vmem [shape: f32[8,16], index: 7, kind: input, shape index: {}]   ;;  %s854_s8 = inlined_call_operand.vmem [shape: f32[1,16], index: 8, kind: input, shape index: {}]   ;;  %s855_s9 = inlined_call_operand.vmem [shape: f32[16,32], index: 9, kind: input, shape index: {}]   ;;  %s856_s10 = inlined_call_operand.vmem [shape: f32[1,32], index: 10, kind: input, shape index: {}]   ;;  %s857_s11 = inlined_call_operand.vmem [shape: bf16[32,256], index: 11, kind: input, shape index: {}]   ;;  %s858_s12 = inlined_call_operand.vmem [shape: f32[1,256], index: 12, kind: input, shape index: {}]   ;;  %s859_s13 = inlined_call_operand.hbm [shape: f32[16,256], index: 13, kind: output, shape index: {0}]   ;;  %s860_s14 = inlined_call_operand.vmem [shape: f32[16,8], index: 14, kind: output, shape index: {1}]  }
   0x1   :  { %v555_v0 = vld [vmem:[%s847_s1 + $0x38] sm:$0xff]  ;;  %v554_v2 = vld [vmem:[%s847_s1 + $0x30] sm:$0xff]  ;;  %v553_v4 = vld [vmem:[%s847_s1 + $0x28] sm:$0xff] }
   0x2   :  { %v563_v1 = vld [vmem:[%s847_s1 + $0x78] sm:$0xff]  ;;  %186 = vmatpush.bf16.msra.mxu0 %v555_v0  ;;  %v562_v3 = vld [vmem:[%s847_s1 + $0x70] sm:$0xff]  ;;  %v561_v5 = vld [vmem:[%s847_s1 + $0x68] sm:$0xff] }
   0x3   :  { %200 = vmatpush.bf16.msra.mxu1 %v563_v1 }
   0x6   :  { %187 = vmatpush.bf16.msra.mxu0 %v554_v2 }
   0x7   :  { %201 = vmatpush.bf16.msra.mxu1 %v562_v3 }
   0x8   :  { %20 = vsyncpa [#allocation3], 0  ;;  %v552_v6 = vld [vmem:[%s847_s1 + $0x20] sm:$0xff]  ;;  %v551_v8 = vld [vmem:[%s847_s1 + $0x18] sm:$0xff]  ;;  %vm224_vm0 = vcmask 261120   ;;  %vm262_vm1 = vcmask 130048  }
   0x9   :  { %v560_v7 = vld [vmem:[%s847_s1 + $0x60] sm:$0xff]  ;;  %v559_v9 = vld [vmem:[%s847_s1 + $0x58] sm:$0xff]  ;;  %v550_v10 = vld [vmem:[%s847_s1 + $0x10] sm:$0xff]  ;;  %vm299_vm2 = vcmask 64512   ;;  %s442_s22 = sshll.u32 %s859_s13, 4  ;;  %s443_s22 = int_to_ptr.hbm [resolvable:$true] %s442_s22 }
   0xa   :  { %188 = vmatpush.bf16.msra.mxu0 %v553_v4  ;;  %v558_v11 = vld [vmem:[%s847_s1 + $0x50] sm:$0xff]  ;;  %v549_v12 = vld [vmem:[%s847_s1 + $0x8] sm:$0xff]  ;;  %v548_v14 = vld [vmem:[%s847_s1] sm:$0xff] }
   0xb   :  { %202 = vmatpush.bf16.msra.mxu1 %v561_v5  ;;  %v557_v13 = vld [vmem:[%s847_s1 + $0x48] sm:$0xff]  ;;  %v556_v15 = vld [vmem:[%s847_s1 + $0x40] sm:$0xff]  ;;  %v50_v17 = vld [vmem:[%s846_s0 + $0x10] sm:$0xff] }
   0xc   :  { %v48_v16 = vld [vmem:[%s846_s0] sm:$0xff]  ;;  %v49_v18 = vld [vmem:[%s846_s0 + $0x8] sm:$0xff]  ;;  %v51_v19 = vld [vmem:[%s846_s0 + $0x18] sm:$0xff] }
   0xd   :  { %v52_v20 = vpack.c.bf16 %v50_v17, %v48_v16  ;;  %v53_v21 = vpack.c.bf16 %v51_v19, %v49_v18  ;;  %v219_v22 = vld [vmem:[%s849_s3 + $0x18] sm:$0xff]  ;;  %v218_v23 = vld [vmem:[%s849_s3 + $0x10] sm:$0xff]  ;;  %v217_v24 = vld [vmem:[%s849_s3 + $0x8] sm:$0xff] }
   0xe   :  { %189 = vmatpush.bf16.msra.mxu0 %v552_v6  ;;  %243 = vmatpush.msra.mxu2 %v219_v22  ;;  %v216_v25 = vld [vmem:[%s849_s3] sm:$0xff]  ;;  %v257_v37 = vld [vmem:[%s851_s5 + $0x8] sm:$0xff]  ;;  %v540_v63 = vld [vmem:[%s857_s11 + $0x10] sm:$0xf] }
   0xf   :  { %203 = vmatpush.bf16.msra.mxu1 %v560_v7  ;;  %v571_v26 = vld [vmem:[%s848_s2] ss:$0 sm:$0xff]  ;;  %283 = vmatpush.msra.mxu3 %v257_v37  ;;  %v332_v47 = vld [vmem:[%s855_s9 + $0x8] sm:$0xff]  ;;  %v567_v0 = vld [vmem:[%s857_s11 + $0x14] sm:$0xf0] }
  0x10   :  { %244 = vmatpush.msra.mxu2 %v218_v23  ;;  %v256_v38 = vld [vmem:[%s851_s5] sm:$0xff]  ;;  %v566_v1 = vld [vmem:[%s857_s11 + $0x14] sm:$0xf]  ;;  %v541_v2 = vor.u32 %v567_v0, %v540_v63  ;;  %v542_v3 = vld [vmem:[%s857_s11 + $0x18] sm:$0xf0] }
  0x11   :  { %284 = vmatpush.msra.mxu3 %v256_v38  ;;  %v294_v39 = vld [vmem:[%s853_s7] sm:$0xff]  ;;  %v545_v4 = vor.u32 %v566_v1, %v542_v3  ;;  %v565_v6 = vld [vmem:[%s857_s11 + $0x4] sm:$0xf0] }
  0x12   :  { %190 = vmatpush.bf16.msra.mxu0 %v551_v8  ;;  %245 = vmatpush.msra.mxu2 %v217_v24  ;;  %v572_v40 = vld [vmem:[%s850_s4] ss:$0 sm:$0xff]  ;;  %v564_v7 = vld [vmem:[%s857_s11 + $0x4] sm:$0xf] }
  0x13   :  { %204 = vmatpush.bf16.msra.mxu1 %v559_v9  ;;  %321 = vmatpush.msrb.mxu3 %v294_v39  ;;  %v573_v48 = vld [vmem:[%s852_s6] ss:$0 sm:$0xff]  ;;  %v534_v9 = vld [vmem:[%s857_s11 + $0x8] sm:$0xf0]  ;;  %s624_s6 = smov 16  }
  0x14   :  { %246 = vmatpush.msra.mxu2 %v216_v25  ;;  %v331_v55 = vld [vmem:[%s855_s9] sm:$0xff] }
  0x15   :  { %v574_v56 = vld [vmem:[%s854_s8] ss:$0 sm:$0xff] }
  0x16   :  { %191 = vmatpush.bf16.msra.mxu0 %v550_v10  ;;  %357 = vmatpush.msrb.mxu2 %v332_v47  ;;  %v532_v5 = vld [vmem:[%s857_s11] sm:$0xf]  ;;  %v537_v10 = vor.u32 %v564_v7, %v534_v9 }
  0x17   :  { %205 = vmatpush.bf16.msra.mxu1 %v558_v11  ;;  %v533_v8 = vor.u32 %v565_v6, %v532_v5  ;;  %v373_v19 = vld [vmem:[%s858_s12] sm:$0x3]  ;;  %s623_s12 = smov 256  }
  0x18   :  { %358 = vmatpush.msrb.mxu2 %v331_v55 }
  0x1a   :  { %192 = vmatpush.bf16.msra.mxu0 %v549_v12  ;;  %v575_v12 = vld [vmem:[%s856_s10] ss:$0 sm:$0xff]  ;;  %s622_s10 = smov [#allocation2]  }
  0x1b   :  { %206 = vmatpush.bf16.msra.mxu1 %v557_v13  ;;  %s440_s20 = sshll.u32 %s622_s10, 4  ;;  %s441_s20 = int_to_ptr.vmem [resolvable:$true] %s440_s20 }
  0x1e   :  { %193 = vmatpush.bf16.msra.mxu0 %v548_v14 }
  0x1f   :  { %207 = vmatpush.bf16.msra.mxu1 %v556_v15 }
  0x21   :  { %194 = vmatmul.bf16.vlgmr.msra.gmra.mxu0 %v52_v20  ;;  %v375_v20 = vperm.slane %v373_v19, 0 }
  0x22   :  { %208 = vmatmul.bf16.vlgmr.msra.gmra.mxu1 %v53_v21  ;;  %v376_v21 = vperm.slane %v373_v19, 1 }
  0x9e   :  { %v195_v27 = vpop.f32.mrf.mxu0 }
  0x9f   :  { %v209_v28 = vpop.f32.mrf.mxu1  ;;  %v196_v29 = vadd.f32 %v571_v26, %v195_v27 }
  0xa1   :  { %v210_v30 = vadd.f32 %v209_v28, %v196_v29 }
  0xa3   :  { %576 = vtanh.f32 %v210_v30 }
  0xa6   :  { %v197_v31 = vpop.f32.mrf.mxu0 }
  0xa7   :  { %v198_v32 = vadd.f32 %v571_v26, %v197_v31  ;;  %v211_v33 = vpop.f32.mrf.mxu1 }
  0xa9   :  { %v577_v34 = vpop.eup %576  ;;  %v212_v35 = vadd.f32 %v211_v33, %v198_v32 }
  0xaa   :  { %522 = vmatmul.msk.f32.vlgmr.msra.gmra.mxu2 %vm224_vm0, %v577_v34 }
  0xab   :  { %578 = vtanh.f32 %v212_v35  ;;  %422 = vmatpush.bf16.msra.mxu2 %v545_v4 }
  0xaf   :  { %423 = vmatpush.bf16.msra.mxu2 %v537_v10 }
  0xb1   :  { %v579_v36 = vpop.eup %578 }
  0xb2   :  { %523 = vmatmul.msk.f32.gmra.mxu2 %vm224_vm0, %v579_v36 }
 0x12d   :  { %v248_v41 = vpop.f32.mrf.mxu2 }
 0x12e   :  { %v249_v42 = vadd.f32 %v572_v40, %v248_v41 }
 0x130   :  { %580 = vtanh.f32 %v249_v42 }
 0x135   :  { %v251_v43 = vpop.f32.mrf.mxu2 }
 0x136   :  { %v581_v44 = vpop.eup %580  ;;  %v252_v45 = vadd.f32 %v572_v40, %v251_v43 }
 0x137   :  { %524 = vmatmul.msk.f32.vlgmr.msra.gmra.mxu3 %vm262_vm1, %v581_v44 }
 0x138   :  { %582 = vtanh.f32 %v252_v45  ;;  %408 = vmatpush.bf16.msra.mxu3 %v541_v2 }
 0x13c   :  { %409 = vmatpush.bf16.msra.mxu3 %v533_v8 }
 0x13e   :  { %v583_v46 = vpop.eup %582 }
 0x13f   :  { %525 = vmatmul.msk.f32.gmra.mxu3 %vm262_vm1, %v583_v46 }
 0x1ba   :  { %v286_v49 = vpop.f32.mrf.mxu3 }
 0x1bb   :  { %v287_v50 = vadd.f32 %v573_v48, %v286_v49 }
 0x1bd   :  { %584 = vtanh.f32 %v287_v50 }
 0x1c2   :  { %v289_v51 = vpop.f32.mrf.mxu3 }
 0x1c3   :  { %v585_v52 = vpop.eup %584  ;;  %v290_v53 = vadd.f32 %v573_v48, %v289_v51 }
 0x1c4   :  { %526 = vmatmul.msk.f32.vlgmr.msrb.gmra.mxu3 %vm299_vm2, %v585_v52  ;;  %430 = vst.msk [vmem:[%s860_s14] sm:$0xff] %vm299_vm2, %v585_v52 }
 0x1c5   :  { %586 = vtanh.f32 %v290_v53 }
 0x1cb   :  { %v587_v54 = vpop.eup %586 }
 0x1cc   :  { %431 = vst.msk [vmem:[%s860_s14 + $0x8] sm:$0xff] %vm299_vm2, %v587_v54  ;;  %527 = vmatmul.msk.f32.gmra.mxu3 %vm299_vm2, %v587_v54 }
 0x247   :  { %v323_v57 = vpop.f32.mrf.mxu3 }
 0x248   :  { %v324_v58 = vadd.f32 %v574_v56, %v323_v57 }
 0x24a   :  { %588 = vtanh.f32 %v324_v58 }
 0x24f   :  { %v326_v59 = vpop.f32.mrf.mxu3 }
 0x250   :  { %v589_v60 = vpop.eup %588  ;;  %v327_v61 = vadd.f32 %v574_v56, %v326_v59 }
 0x251   :  { %528 = vmatmul.msk.f32.vlgmr.msrb.gmra.mxu2 %vm262_vm1, %v589_v60 }
 0x252   :  { %590 = vtanh.f32 %v327_v61 }
 0x258   :  { %v591_v62 = vpop.eup %590 }
 0x259   :  { %529 = vmatmul.msk.f32.gmra.mxu2 %vm262_vm1, %v591_v62 }
 0x2d4   :  { %v360_v11 = vpop.f32.mrf.mxu2 }
 0x2d5   :  { %v361_v13 = vadd.f32 %v575_v12, %v360_v11 }
 0x2d7   :  { %592 = vtanh.f32 %v361_v13 }
 0x2dc   :  { %v363_v14 = vpop.f32.mrf.mxu2 }
 0x2dd   :  { %v364_v15 = vadd.f32 %v575_v12, %v363_v14  ;;  %v593_v16 = vpop.eup %592 }
 0x2df   :  { %594 = vtanh.f32 %v364_v15 }
 0x2e5   :  { %v595_v17 = vpop.eup %594 }
 0x2e6   :  { %v368_v18 = vpack.c.bf16 %v595_v17, %v593_v16 }
 0x2e8   :  { %546 = vmatmul.msk.bf16.vlgmr.msra.gmra.mxu3 %vm224_vm0, %v368_v18  ;;  %547 = vmatmul.msk.bf16.vlgmr.msra.gmra.mxu2 %vm224_vm0, %v368_v18 }
 0x36b   :  { %v411_v22 = vpop.f32.mrf.mxu3  ;;  %v425_v23 = vpop.f32.mrf.mxu2 }
 0x36c   :  { %v412_v24 = vadd.f32 %v411_v22, %v375_v20  ;;  %v426_v25 = vadd.f32 %v425_v23, %v376_v21 }
 0x36e   :  { %432 = vst [vmem:[#allocation2] sm:$0xff] %v412_v24 }
 0x36f   :  { %433 = vst [vmem:[#allocation2 + $0x8] sm:$0xff] %v426_v25 }
 0x373   :  { %v413_v26 = vpop.f32.mrf.mxu3  ;;  %v427_v27 = vpop.f32.mrf.mxu2 }
 0x374   :  { %v414_v28 = vadd.f32 %v413_v26, %v375_v20  ;;  %v428_v29 = vadd.f32 %v427_v27, %v376_v21 }
 0x376   :  { %434 = vst [vmem:[#allocation2 + $0x10] sm:$0xff] %v414_v28 }
 0x377   :  { %435 = vst [vmem:[#allocation2 + $0x18] sm:$0xff] %v428_v29 }
 0x378   :  { %448 = dma.vmem_to_hbm [thread:$0]  %s441_s20, 512, %s443_s22, [#allocation3], %s623_s12, %s623_s12, %s624_s6  }
 0x379   :  { %620 = dma.done.wait [#allocation3], 512  }
 0x37a   :  { %621 = vsyncadd [#allocation3], 4294966784 }
 0x37b   :  { %457 = vsyncpa [#allocation3], 1 }

</bundles_post_ra>
